<compile_context>
chip_gen: v7x
topology: tpu7x:2x2x1
jax: 0.10.0
libtpu: 0.0.40
codegen_flags: <defaults>
</compile_context>

<pallas_src>
import functools

import jax
import jax.numpy as jnp
from jax.experimental import pallas as pl
from jax.experimental.pallas import tpu as pltpu

NEG_PAD = -2.0 ** 16 + 1.0          # -65535.0, same pad value as the PyTorch code
_VMEM_LIMIT = 32 * 1024 * 1024      # explicit scoped-VMEM guardrail (all gens)


def _eup_reciprocal(x):
    """EUP approximate reciprocal + one Newton refinement step.

    The table lookup runs on the otherwise-idle EUP slot (freeing VALU, which
    is the only busy slot in this kernel); the single Newton step (2 cheap VALU
    ops) restores ~f32 accuracy so the result matches the reference
    exact-divide formulation within tolerance.
    """
    r = pl.reciprocal(x, approx=True)
    return r * (2.0 - x * r)


def routing_kernel(seq_len_ref, low_ref, s_ref, b0_ref, high_ref, *, iteration):
    """Routing.forward (all routing iterations fused) for one block of batches.

    seq_len_ref : VMEM [Bk, 1, 1] int32
    low_ref     : VMEM [Bk, L, E] f32/bf16
    s_ref       : VMEM [E, O]     f32     (S_matrix)
    b0_ref      : VMEM [1, K, M]  f32     (initial B_matrix, M == L)
    high_ref    : VMEM [Bk, K, O] f32     (output high capsules)

    Bk is the per-invocation batch block: the full B for the fused
    multi-iteration path, 1 for the batch-parallel (iteration == 1) path.
    """
    Bk, L, E = low_ref.shape
    _, K, M = b0_ref.shape
    O = s_ref.shape[1]

    # ------------- iteration-invariant precomputation (hoisted) -------------
    # low_new = rowsum(low) (outer) colsum(S): rank-1, never materialize [B,L,O].
    low = low_ref[...].astype(jnp.float32)                     # [Bk, L, E]
    rowsum = jnp.sum(low, axis=2)                              # [Bk, M]
    rowsum_b1m = rowsum[:, None, :]                            # [Bk, 1, M]
    colsum = jnp.sum(s_ref[...].astype(jnp.float32), axis=0)   # [O]
    colsum_11o = colsum[None, None, :]                         # [1, 1, O]

    # Sequence mask: single vectorized compare, broadcast once over K (hoisted
    # so the loop below never re-broadcasts; JAX does not CSE broadcasts).
    pos = jax.lax.broadcasted_iota(jnp.int32, (Bk, 1, M), 2)   # [Bk, 1, M]
    lens = seq_len_ref[...]                                    # [Bk, 1, 1] int32
    mask = jnp.broadcast_to(pos < lens, (Bk, K, M))            # [Bk, K, M] bool
    neg = jnp.float32(NEG_PAD)

    # ------------------------- fused routing iterations ---------------------
    # NOTE: iteration is small (typically 1-2) so a static unroll is fine; if
    # it ever grows past ~4, switch to lax.fori_loop to bound vreg live ranges.
    bmat = b0_ref[...].astype(jnp.float32)                     # [1, K, M]
    high = jnp.zeros((Bk, K, O), jnp.float32)
    for it in range(iteration):                                # static, unrolled
        b_tile = jnp.broadcast_to(bmat, (Bk, K, M))
        b_mask = jnp.where(mask, b_tile, neg)
        b_max = jnp.max(b_mask, axis=-1, keepdims=True)
        e = jnp.exp(b_mask - b_max)                            # EUP exp
        denom = jnp.sum(e, axis=-1, keepdims=True)
        w = e * _eup_reciprocal(denom)                         # softmax [Bk,K,M]

        # high_tmp[b,k,o] = (sum_m w[b,k,m] * rowsum[b,m]) * colsum[o]
        wr = jnp.sum(w * rowsum_b1m, axis=-1, keepdims=True)   # [Bk, K, 1]
        high_tmp = wr * colsum_11o                             # [Bk, K, O]

        # squash over the capsule axis (K), as in the reference (dim=1)
        sq = jnp.sum(high_tmp * high_tmp, axis=1, keepdims=True)       # [Bk,1,O]
        scale = sq * _eup_reciprocal(1.0 + sq) * jax.lax.rsqrt(sq + 1e-9)
        high = scale * high_tmp                                # [Bk, K, O]

        if it + 1 < iteration:
            # B_delta[0,k,m] = sum_b (high[b,k,:] . colsum) * rowsum[b,m]
            hc = jnp.sum(high * colsum_11o, axis=-1, keepdims=True)    # [Bk,K,1]
            bdelta = jnp.sum(hc * rowsum_b1m, axis=0, keepdims=True)   # [1,K,M]
            bmat = bmat + bdelta

    # NOTE: at O=32 / K=3 the store is sub-vreg either way; if O or K scale,
    # present the output as a lane-dense [B*K, O] slab (wrapper-side reshape)
    # to avoid masked vst partial stores.
    high_ref[...] = high


def routing_forward(low_capsule, seq_len, s_matrix, b_matrix, iteration=1):
    """Pallas-backed equivalent of Routing.forward (returns high_capsule).

    low_capsule : [B, L, E] f32 (or bf16; cast happens inside the kernel)
    seq_len     : [B, 1]    int  (max(seq_len) must equal L, as in the module)
    s_matrix    : [E, O]    f32
    b_matrix    : [1, K, L] f32  (initial B_matrix; passed in for determinism)
    """
    B, L, E = low_capsule.shape
    _, K, M = b_matrix.shape
    O = s_matrix.shape[1]
    assert M == L, "max_len (B_matrix last dim) must equal the sequence length"

    seq_len_v = jnp.asarray(seq_len).astype(jnp.int32).reshape(B, 1, 1)
    kernel = functools.partial(routing_kernel, iteration=iteration)

    if iteration == 1 and B > 1:
        # No B_matrix carry across iterations -> batches are independent.
        # Grid over B; "parallel" lets v7x's two TensorCores split the batch.
        # On 1-TC chips (v5e/v6e) this is a short serial loop (~0.35us/step),
        # negligible at these sizes.
        return pl.pallas_call(
            kernel,
            out_shape=jax.ShapeDtypeStruct((B, K, O), jnp.float32),
            grid=(B,),
            in_specs=[
                pl.BlockSpec((1, 1, 1), lambda b: (b, 0, 0)),   # seq_len
                pl.BlockSpec((1, L, E), lambda b: (b, 0, 0)),   # low_capsule
                pl.BlockSpec((E, O), lambda b: (0, 0)),         # S_matrix
                pl.BlockSpec((1, K, M), lambda b: (0, 0, 0)),   # B_matrix
            ],
            out_specs=pl.BlockSpec((1, K, O), lambda b: (b, 0, 0)),
            compiler_params=pltpu.CompilerParams(
                dimension_semantics=("parallel",),
                vmem_limit_bytes=_VMEM_LIMIT),
        )(seq_len_v, low_capsule, s_matrix, b_matrix)

    # iteration > 1 (or B == 1): B_delta reduces over the batch every
    # iteration, so keep everything fused in a single VMEM-resident call.
    # If B*L*E ever grows past a few MiB, tile low_capsule over B/L here with
    # (8,128)-aligned blocks (v7x has only 64 MiB physical VMEM).
    return pl.pallas_call(
        kernel,
        out_shape=jax.ShapeDtypeStruct((B, K, O), jnp.float32),
        in_specs=[
            pl.BlockSpec(memory_space=pltpu.MemorySpace.VMEM),  # seq_len
            pl.BlockSpec(memory_space=pltpu.MemorySpace.VMEM),  # low_capsule
            pl.BlockSpec(memory_space=pltpu.MemorySpace.VMEM),  # S_matrix
            pl.BlockSpec(memory_space=pltpu.MemorySpace.VMEM),  # B_matrix
        ],
        out_specs=pl.BlockSpec(memory_space=pltpu.MemorySpace.VMEM),
        compiler_params=pltpu.CompilerParams(vmem_limit_bytes=_VMEM_LIMIT),
    )(seq_len_v, low_capsule, s_matrix, b_matrix)


def routing_reference(low, seq_len, S, Bmat, iteration=1):
    """Pure-JAX line-by-line port of the PyTorch forward (for verification)."""
    B, L, E = low.shape
    _, K, M = Bmat.shape
    bmat = Bmat
    high = None
    for _ in range(iteration):
        pos = jnp.arange(M)[None, None, :]
        mask = pos < seq_len.reshape(B, 1, 1)
        b_tile = jnp.broadcast_to(bmat, (B, K, M))
        b_mask = jnp.where(mask, b_tile, NEG_PAD)
        w = jax.nn.softmax(b_mask, axis=-1)
        low_new = jnp.einsum('ijk,lo->ijo', low, S)            # same "buggy" einsum
        high_tmp = jnp.matmul(w, low_new)
        sq = jnp.sum(jnp.square(high_tmp), axis=1, keepdims=True)
        scale = sq / (1.0 + sq) / jnp.sqrt(sq + 1e-9)
        high = scale * high_tmp
        bd = jnp.sum(jnp.matmul(high, jnp.swapaxes(low_new, 1, 2)),
                     axis=0, keepdims=True)
        bmat = bmat + bd
    return high


if __name__ == "__main__":
    # Small shapes implied by the module: B=2, max_len=8, input_units=16,
    # output_units=32, max_k=3.
    B, L, E, O, K = 2, 8, 16, 32, 3

    key = jax.random.PRNGKey(0)
    k_low, k_s, k_b = jax.random.split(key, 3)

    low_capsule = jax.random.normal(k_low, (B, L, E), dtype=jnp.float32)
    # Deterministic parameter init (matches nn.init.normal_(mean=0, std=1) shapes).
    S_matrix = jax.random.normal(k_s, (E, O), dtype=jnp.float32)
    B_matrix = jax.random.normal(k_b, (1, K, L), dtype=jnp.float32)
    # seq_len: [B, 1]; its max must equal L (the module asserts/relies on this).
    seq_len = jnp.array([[L], [5]], dtype=jnp.int32)

    ok = True
    for iteration in (1, 2):
        out = routing_forward(low_capsule, seq_len, S_matrix, B_matrix, iteration)
        out = jax.block_until_ready(out)
        ref = routing_reference(low_capsule, seq_len, S_matrix, B_matrix, iteration)
        ref = jax.block_until_ready(ref)
        assert out.shape == (B, K, O)
        # 1e-3 tolerance: covers EUP-approx(+Newton) reciprocal / rsqrt drift
        # and the rank-1 reassociation vs the reference batched matmuls.
        ok = ok and bool(jnp.allclose(out, ref, rtol=1e-3, atol=1e-3))

    assert ok, "mismatch vs reference"
    print("KERNEL_OK")
</pallas_src>

<mosaic_0001>
module attributes {stable_mosaic.version = 11 : i64} {
  func.func @routing_kernel(%arg0: i32, %arg1: memref<1x1x1xi32, #tpu.memory_space<vmem>>, %arg2: memref<1x8x16xf32, #tpu.memory_space<vmem>>, %arg3: memref<16x32xf32, #tpu.memory_space<vmem>>, %arg4: memref<1x3x8xf32, #tpu.memory_space<vmem>>, %arg5: memref<1x3x32xf32, #tpu.memory_space<vmem>>) attributes {dimension_semantics = [#tpu.dimension_semantics<parallel>], iteration_bounds = array<i64: 2>, scalar_prefetch = 0 : i64, scratch_operands = 0 : i64, tpu.core_type = #tpu.core_type<tc>, window_params = [{transform_indices = @transform_0, window_bounds = array<i64: 1, 1, 1>}, {transform_indices = @transform_1, window_bounds = array<i64: 1, 8, 16>}, {pipeline_mode = #tpu.pipeline_mode<synchronous>, transform_indices = @transform_2, window_bounds = array<i64: 16, 32>}, {pipeline_mode = #tpu.pipeline_mode<synchronous>, transform_indices = @transform_3, window_bounds = array<i64: 1, 3, 8>}, {transform_indices = @transform_4, window_bounds = array<i64: 1, 3, 32>}]} {
    %c0 = arith.constant 0 : index
    %c0_0 = arith.constant 0 : index
    %c0_1 = arith.constant 0 : index
    %0 = vector.load %arg2[%c0, %c0_0, %c0_1] : memref<1x8x16xf32, #tpu.memory_space<vmem>>, vector<1x8x16xf32>
    %cst = arith.constant dense<0.000000e+00> : vector<1x8xf32>
    %1 = vector.multi_reduction <add>, %0, %cst [2] : vector<1x8x16xf32> to vector<1x8xf32>
    %2 = vector.shape_cast %1 : vector<1x8xf32> to vector<1x1x8xf32>
    %c0_2 = arith.constant 0 : index
    %c0_3 = arith.constant 0 : index
    %3 = vector.load %arg3[%c0_2, %c0_3] : memref<16x32xf32, #tpu.memory_space<vmem>>, vector<16x32xf32>
    %cst_4 = arith.constant dense<0.000000e+00> : vector<32xf32>
    %4 = vector.multi_reduction <add>, %3, %cst_4 [0] : vector<16x32xf32> to vector<32xf32>
    %5 = vector.shape_cast %4 : vector<32xf32> to vector<1x1x32xf32>
    %6 = tpu.iota {dimensions = array<i32: 2>} : vector<1x1x8xi32>
    %c0_5 = arith.constant 0 : index
    %c0_6 = arith.constant 0 : index
    %c0_7 = arith.constant 0 : index
    %7 = vector.load %arg1[%c0_5, %c0_6, %c0_7] : memref<1x1x1xi32, #tpu.memory_space<vmem>>, vector<1x1x1xi32>
    %8 = vector.broadcast %7 : vector<1x1x1xi32> to vector<1x1x8xi32>
    %9 = arith.cmpi slt, %6, %8 : vector<1x1x8xi32>
    %10 = vector.shape_cast %9 : vector<1x1x8xi1> to vector<1x1x8xi1>
    %11 = vector.broadcast %10 : vector<1x1x8xi1> to vector<1x3x8xi1>
    %c0_8 = arith.constant 0 : index
    %c0_9 = arith.constant 0 : index
    %c0_10 = arith.constant 0 : index
    %12 = vector.load %arg4[%c0_8, %c0_9, %c0_10] : memref<1x3x8xf32, #tpu.memory_space<vmem>>, vector<1x3x8xf32>
    %cst_11 = arith.constant -6.553500e+04 : f32
    %13 = vector.broadcast %cst_11 : f32 to vector<1x3x8xf32>
    %14 = arith.select %11, %12, %13 : vector<1x3x8xi1>, vector<1x3x8xf32>
    %cst_12 = arith.constant dense<0xFF800000> : vector<1x3xf32>
    %15 = vector.multi_reduction <maximumf>, %14, %cst_12 [2] : vector<1x3x8xf32> to vector<1x3xf32>
    %16 = vector.shape_cast %15 : vector<1x3xf32> to vector<1x3x1xf32>
    %17 = vector.broadcast %16 : vector<1x3x1xf32> to vector<1x3x8xf32>
    %18 = arith.subf %14, %17 : vector<1x3x8xf32>
    %19 = math.exp %18 : vector<1x3x8xf32>
    %cst_13 = arith.constant dense<0.000000e+00> : vector<1x3xf32>
    %20 = vector.multi_reduction <add>, %19, %cst_13 [2] : vector<1x3x8xf32> to vector<1x3xf32>
    %21 = vector.shape_cast %20 : vector<1x3xf32> to vector<1x3x1xf32>
    %22 = tpu.reciprocal %21 {approx = true} : vector<1x3x1xf32> -> vector<1x3x1xf32>
    %23 = arith.mulf %21, %22 : vector<1x3x1xf32>
    %cst_14 = arith.constant 2.000000e+00 : f32
    %24 = vector.broadcast %cst_14 : f32 to vector<1x3x1xf32>
    %25 = arith.subf %24, %23 : vector<1x3x1xf32>
    %26 = arith.mulf %22, %25 : vector<1x3x1xf32>
    %27 = vector.broadcast %26 : vector<1x3x1xf32> to vector<1x3x8xf32>
    %28 = arith.mulf %19, %27 : vector<1x3x8xf32>
    %29 = vector.broadcast %2 : vector<1x1x8xf32> to vector<1x3x8xf32>
    %30 = arith.mulf %28, %29 : vector<1x3x8xf32>
    %cst_15 = arith.constant dense<0.000000e+00> : vector<1x3xf32>
    %31 = vector.multi_reduction <add>, %30, %cst_15 [2] : vector<1x3x8xf32> to vector<1x3xf32>
    %32 = vector.shape_cast %31 : vector<1x3xf32> to vector<1x3x1xf32>
    %33 = vector.broadcast %32 : vector<1x3x1xf32> to vector<1x3x32xf32>
    %34 = vector.broadcast %5 : vector<1x1x32xf32> to vector<1x3x32xf32>
    %35 = arith.mulf %33, %34 : vector<1x3x32xf32>
    %36 = arith.mulf %35, %35 : vector<1x3x32xf32>
    %cst_16 = arith.constant dense<0.000000e+00> : vector<1x32xf32>
    %37 = vector.multi_reduction <add>, %36, %cst_16 [1] : vector<1x3x32xf32> to vector<1x32xf32>
    %38 = vector.shape_cast %37 : vector<1x32xf32> to vector<1x1x32xf32>
    %cst_17 = arith.constant 1.000000e+00 : f32
    %39 = vector.broadcast %cst_17 : f32 to vector<1x1x32xf32>
    %40 = arith.addf %39, %38 : vector<1x1x32xf32>
    %41 = tpu.reciprocal %40 {approx = true} : vector<1x1x32xf32> -> vector<1x1x32xf32>
    %42 = arith.mulf %40, %41 : vector<1x1x32xf32>
    %cst_18 = arith.constant 2.000000e+00 : f32
    %43 = vector.broadcast %cst_18 : f32 to vector<1x1x32xf32>
    %44 = arith.subf %43, %42 : vector<1x1x32xf32>
    %45 = arith.mulf %41, %44 : vector<1x1x32xf32>
    %46 = arith.mulf %38, %45 : vector<1x1x32xf32>
    %cst_19 = arith.constant 9.99999971E-10 : f32
    %47 = vector.broadcast %cst_19 : f32 to vector<1x1x32xf32>
    %48 = arith.addf %38, %47 : vector<1x1x32xf32>
    %49 = math.rsqrt %48 : vector<1x1x32xf32>
    %50 = arith.mulf %46, %49 : vector<1x1x32xf32>
    %51 = vector.broadcast %50 : vector<1x1x32xf32> to vector<1x3x32xf32>
    %52 = arith.mulf %51, %35 : vector<1x3x32xf32>
    %c0_20 = arith.constant 0 : index
    %c0_21 = arith.constant 0 : index
    %c0_22 = arith.constant 0 : index
    %53 = vector.load %arg5[%c0_20, %c0_21, %c0_22] : memref<1x3x32xf32, #tpu.memory_space<vmem>>, vector<1x3x32xf32>
    tpu.vector_store %arg5[%c0_20, %c0_21, %c0_22], %52 {strides = array<i32>} : memref<1x3x32xf32, #tpu.memory_space<vmem>>, vector<1x3x32xf32>,
    return
  }
  func.func @transform_0(%arg0: i32) -> (i32, i32, i32) {
    %c0_i32 = arith.constant 0 : i32
    %c0_i32_0 = arith.constant 0 : i32
    %c0_i32_1 = arith.constant 0 : i32
    return %arg0, %c0_i32, %c0_i32_0 : i32, i32, i32
  }
  func.func @transform_1(%arg0: i32) -> (i32, i32, i32) {
    %c0_i32 = arith.constant 0 : i32
    %c0_i32_0 = arith.constant 0 : i32
    %c0_i32_1 = arith.constant 0 : i32
    return %arg0, %c0_i32, %c0_i32_0 : i32, i32, i32
  }
  func.func @transform_2(%arg0: i32) -> (i32, i32) {
    %c0_i32 = arith.constant 0 : i32
    %c0_i32_0 = arith.constant 0 : i32
    %c0_i32_1 = arith.constant 0 : i32
    return %c0_i32, %c0_i32_0 : i32, i32
  }
  func.func @transform_3(%arg0: i32) -> (i32, i32, i32) {
    %c0_i32 = arith.constant 0 : i32
    %c0_i32_0 = arith.constant 0 : i32
    %c0_i32_1 = arith.constant 0 : i32
    %c0_i32_2 = arith.constant 0 : i32
    return %c0_i32, %c0_i32_0, %c0_i32_1 : i32, i32, i32
  }
  func.func @transform_4(%arg0: i32) -> (i32, i32, i32) {
    %c0_i32 = arith.constant 0 : i32
    %c0_i32_0 = arith.constant 0 : i32
    %c0_i32_1 = arith.constant 0 : i32
    return %arg0, %c0_i32, %c0_i32_0 : i32, i32, i32
  }
}

</mosaic_0001>

<bundles_post_ra>
// kernel: tpu_custom_call.1
= control target key start
LH: loop header
LB: loop body
LE: loop exit
PB: predicated region body
PF: predicated region fallthrough
CT: control target
= control target key end

     0   :  { %9 = vsyncpa [#allocation3], 0  ;;  %s664_s0 = inlined_call_operand.vmem [shape: s32[2,1,1], index: 0, kind: input, shape index: {}]   ;;  %s665_s1 = inlined_call_operand.hbm [shape: f32[2,8,16], index: 1, kind: input, shape index: {}]   ;;  %s666_s2 = inlined_call_operand.vmem [shape: f32[16,32], index: 2, kind: input, shape index: {}]   ;;  %s667_s3 = inlined_call_operand.vmem [shape: f32[1,3,8], index: 3, kind: input, shape index: {}]   ;;  %s668_s4 = inlined_call_operand.vmem [shape: f32[2,3,32], index: 4, kind: output, shape index: {}]  }
   0x1   :  { %11 = vsyncpa [#allocation3 + $0x1], 0  ;;  %s533_s15 = smov 0   ;;  %s535_s16 = smov 0  }
   0x2   :  { %s537_s17 = smov 0   ;;  %s539_s18 = smov 0  }
   0x3 LB: > { %s552_s19 = sadd.s32 4294967295, %s504_s18   ;;  %s555_s20 = sadd.s32 1, %s504_s18   ;;  %s504_s18 = sphi %s539_s18, %s676_s18   ;;  %s500_s17 = sphi %s537_s17, %s675_s17   ;;  %s496_s16 = sphi %s535_s16, %s674_s16   ;;  %s492_s15 = sphi %s533_s15, %s673_s15  }
   0x4   : > { %s47_s21 = ssub.s32 %s504_s18, %s555_s20  ;;  %s50_s22 = sadd.s32 1, %s500_s17 }
   0x5   : > { %p48_p0 = scmp.eq.s32.totalorder %s47_s21, 0  ;;  %p57_p1 = scmp.ne.s32.totalorder %s500_s17, %s496_s16 }
   0x6   : > { %p58_p2 = scmp.eq.s32.totalorder %s504_s18, 0  ;;  %p63_p3 = scmp.ne.s32.totalorder %s496_s16, %s492_s15 }
   0x7   : > { %s565_s23 = scalar_select %p48_p0, %s500_s17, %s50_s22  }
   0x8   : > { %p59_p4 = por %p58_p2, %p57_p1  ;;  %p64_p5 = scmp.eq.s32.totalorder %s552_s19, 0 }
   0x9   : > { %p397_p6 = scmp.lt.s32.totalorder %s504_s18, 2  ;;  %s167_s25 = sand.u32 1, %s500_s17  }
   0xa   : > { %p569_p7 = por %p64_p5, %p63_p3  ;;  %s384_s26 = sshll.u32 %s167_s25, 3 }
   0xb   : > { %s385_s27 = sshll.u32 %s504_s18, 7  ;;  %s171_s5 = scalar_lea.vmem [#allocation2], %s384_s26 }
   0xc   : > { %s578_s30 = scalar_lea.hbm %s665_s1, %s385_s27  ;;  %s178_s6 = sshll.u32 %s171_s5, 4  ;;  %s580_s6 = int_to_ptr.vmem [resolvable:$true] %s178_s6 }
   0xd   : > { %p582_p8 = pnand %p397_p6, %p59_p4  ;;  %s168_s8 = scalar_lea.sflag [#allocation3], %s167_s25 }
   0xe   : > { %s440_s9 = scalar_lea.hbm %s578_s30, 128  ;;  %s445_s12 = scalar_lea.hbm %s665_s1, 256 }
   0xf   : > { %p441_p11 = scmp.ne.s32.totalorder %s578_s30, %s440_s9  ;;  %p442_p12 = pneg %p582_p8 }
  0x10   : > { %p446_p1 = scmp.lt.u32.totalorder %s578_s30, %s665_s1  ;;  %p447_p2 = scmp.lt.u32.totalorder %s445_s12, %s440_s9 }
  0x11   : > { %p443_p13 = pnand %p442_p12, %p441_p11  ;;  %p449_p4 = scmp.lt.u32.totalorder %s440_s9, %s578_s30 }
  0x12   : > { %p448_p3 = por %p447_p2, %p446_p1 }
  0x13   : > { %p444_p0 = pneg %p443_p13 }
  0x14   : > { %p450_p5 = por %p449_p4, %p448_p3 }
  0x16   : > { %p451_p6 = pnand %p450_p5, %p444_p0 }
  0x18   : > { %454 = shalt.err (!%p451_p6)
}
  0x19   : > { %s455_s15 = scalar_lea.vmem %s580_s6, 128  ;;  %s506_s21 = smov [#allocation2]  }
  0x1a   : > { %p456_p11 = scmp.ne.s32.totalorder %s580_s6, %s455_s15  ;;  %s460_s22 = sshll.u32 %s506_s21, 4  ;;  %s461_s22 = int_to_ptr.vmem [resolvable:$false] %s460_s22 }
  0x1b   : > { %s462_s25 = scalar_lea.vmem %s461_s22, 256  ;;  %p463_p10 = scmp.lt.s32.totalorder %s580_s6, %s461_s22 }
  0x1c   : > { %p458_p13 = pnand %p456_p11, %p442_p12  ;;  %p464_p1 = scmp.lt.s32.totalorder %s462_s25, %s455_s15 }
  0x1e   : > { %p459_p9 = pneg %p458_p13  ;;  %p465_p2 = por %p464_p1, %p463_p10 }
  0x20   : > { %p466_p3 = pnand %p465_p2, %p459_p9 }
  0x22   : > { %469 = shalt.err (!%p466_p3)
}
  0x23   : > { %396 = dma.hbm_to_vmem [thread:$0]  (!%p582_p8), %s578_s30, 128, %s580_s6, %s168_s8  }
  0x24   : > { %p671_p0 = scmp.lt.s32.totalorder %s504_s18, 3  ;;  %p672_p4 = scmp.ge.s32.totalorder %s504_s18, 1 }
  0x26   : > { %p184_p12 = pnand %p672_p4, %p671_p0 }
  0x27   : > { %s189_s26 = sand.u32 (!%p184_p12), 1, %s496_s16  }
  0x28   : > { %187 = sbr.rel (%p184_p12) target bundleno = 693 (0x2b5), region = 36  ;;  %s618_s27 = sshll.u32 (!%p184_p12), %s189_s26, 3 }
  0x29   : > { %s190_s28 = scalar_lea.sflag (!%p184_p12), [#allocation3], %s189_s26  ;;  %s193_s29 = scalar_lea.vmem (!%p184_p12), [#allocation2], %s618_s27 }
  0x2f   : > { %487 = dma.done.wait (%p569_p7), %s190_s28, 128  }
  0x30   : > { %489 = vsyncadd (%p569_p7), %s190_s28, 4294967168  ;;  %p220_p8 = scmp.lt.s32.totalorder %s552_s19, 1  ;;  %v507_v0 = vmov 0   ;;  %v244_v2 = vlaneseq  ;;  %v257_v8 = vld [vmem:[%s667_s3] sm:$0x7]  ;;  %vm259_vm0 = vcmask 59392  }
  0x31   : > { %431 = vset.pattern.permute.xlu0 %v507_v0  ;;  %v227_v15 = vld [vmem:[%s193_s29] sm:$0xff]  ;;  %vm228_vm2 = vcmask 130048   ;;  %v233_v30 = vld [vmem:[%s666_s2 + $0x8] sm:$0xff]  ;;  %vm234_vm3 = vcmask 261120   ;;  %vm288_vm4 = vcmask 256000  }
  0x32   : > { %s678_s19 = smov (!%p220_p8, %s552_s19), 1  ;;  %v251_v3 = vshrl.u32 %v244_v2, 7  ;;  %v245_v5 = vand.u32 127, %v244_v2  ;;  %v229_v17 = vsel %vm228_vm2, %v227_v15, 0.0  ;;  %v232_v29 = vld [vmem:[%s666_s2] sm:$0xff]  ;;  %v236_v32 = vsel %vm234_vm3, %v233_v30, 0.0 }
  0x33   : > { %s222_s5 = scalar_lea.vmem %s664_s0, %s678_s19  ;;  %v235_v31 = vsel %vm234_vm3, %v232_v29, 0.0  ;;  %s388_s11 = sshll.u32 %s678_s19, 2 }
  0x34   : > { %v246_v1 = vld [vmem:[%s222_s5] sm:$0x1]  ;;  %v252_v4 = vsub.s32 0, %v251_v3  ;;  %v277_v21 = vsub.s32 %v245_v5, %v251_v3  ;;  %v237_v33 = vadd.f32 %v236_v32, %v235_v31  ;;  %s226_s14 = scalar_lea.vmem %s668_s4, %s388_s11 }
  0x35   : > { %248 = vperm.xlu0 %431, %v246_v1  }
  0x36   : > { %v238_v34 = vrot.slane %v237_v33, 4 }
  0x38   : > { %v239_v35 = vadd.f32 %v238_v34, %v237_v33 }
  0x3a   : > { %v240_v36 = vrot.slane %v239_v35, 2 }
  0x3c   : > { %v241_v37 = vadd.f32 %v240_v36, %v239_v35 }
  0x3e   : > { %v242_v38 = vrot.slane %v241_v37, 1 }
  0x40   : > { %v243_v39 = vadd.f32 %v242_v38, %v241_v37 }
  0xb4   : > { %v249_v6 = vpop.permute.xlu0 %248 }
  0xb5   : > { %v253_v7 = vrot.slane %v249_v6, %v252_v4 }
  0xb7   : > { %vm254_vm1 = vcmp.lt.s32.totalorder %v245_v5, %v253_v7 }
  0xb8   : > { %v258_v9 = vsel %vm254_vm1, %v257_v8, -65535.0 }
  0xb9   : > { %v260_v10 = vsel %vm259_vm0, %v258_v9, -inf }
  0xba   : > { %261 = vmax.xlane.f32.xlu0 %v260_v10 }
 0x147   : > { %v262_v11 = vpop.xlane.xlu0 %261 }
 0x148   : > { %v263_v12 = vsub.f32 %v258_v9, %v262_v11 }
 0x14a   : > { %v264_v13 = vmul.f32 1.442695, %v263_v12 }
 0x14c   : > { %432 = vpow2.f32 %v264_v13 }
 0x156   : > { %v433_v14 = vpop.eup %432 }
 0x157   : > { %v266_v16 = vsel %vm259_vm0, %v433_v14, 0.0 }
 0x158   : > { %267 = vadd.xlane.f32.xlu1 %v266_v16 }
 0x15c   : > { %230 = vadd.xlane.f32.xlu1 %v229_v17 }
 0x1e5   : > { %v268_v18 = vpop.xlane.xlu1 %267 }
 0x1e6   : > { %434 = vrcp.f32 %v268_v18 }
 0x1e9   : > { %v231_v22 = vpop.xlane.xlu1 %230 }
 0x1ea   : > { %v278_v25 = vrot.slane %v231_v22, %v277_v21 }
 0x1f0   : > { %v435_v19 = vpop.eup %434 }
 0x1f1   : > { %v270_v20 = vmul.f32 %v435_v19, %v268_v18 }
 0x1f3   : > { %v271_v23 = vsub.f32 2.0, %v270_v20 }
 0x1f5   : > { %v272_v24 = vmul.f32 %v435_v19, %v271_v23 }
 0x1f7   : > { %v273_v26 = vmul.f32 %v433_v14, %v272_v24 }
 0x1f9   : > { %v282_v27 = vmul.f32 %v278_v25, %v273_v26 }
 0x1fb   : > { %v283_v28 = vsel %vm259_vm0, %v282_v27, 0.0 }
 0x1fc   : > { %284 = vadd.xlane.f32.xlu1 %v283_v28 }
 0x289   : > { %v285_v40 = vpop.xlane.xlu1 %284 }
 0x28a   : > { %v286_v41 = vmul.f32 %v285_v40, %v243_v39 }
 0x28c   : > { %v287_v42 = vmul.f32 %v286_v41, %v286_v41 }
 0x28e   : > { %v289_v43 = vsel %vm288_vm4, %v287_v42, 0.0 }
 0x28f   : > { %v290_v44 = vrot.slane %v289_v43, 4 }
 0x291   : > { %v291_v45 = vadd.f32 %v290_v44, %v289_v43 }
 0x293   : > { %v292_v46 = vrot.slane %v291_v45, 2 }
 0x295   : > { %v293_v47 = vadd.f32 %v292_v46, %v291_v45 }
 0x297   : > { %v294_v48 = vrot.slane %v293_v47, 1 }
 0x299   : > { %v295_v49 = vadd.f32 %v294_v48, %v293_v47 }
 0x29b   : > { %v296_v50 = vadd.f32 1.0, %v295_v49  ;;  %v302_v51 = vadd.f32 1e-09, %v295_v49 }
 0x29d   : > { %436 = vrcp.f32 %v296_v50 }
 0x29e   : > { %438 = vrsqrt.f32 %v302_v51 }
 0x2a7   : > { %v437_v52 = vpop.eup %436 }
 0x2a8   : > { %v298_v53 = vmul.f32 %v437_v52, %v296_v50  ;;  %v439_v57 = vpop.eup %438 }
 0x2aa   : > { %v299_v54 = vsub.f32 2.0, %v298_v53 }
 0x2ac   : > { %v300_v55 = vmul.f32 %v437_v52, %v299_v54 }
 0x2ae   : > { %v301_v56 = vmul.f32 %v300_v55, %v295_v49 }
 0x2b0   : > { %v304_v58 = vmul.f32 %v439_v57, %v301_v56 }
 0x2b2   : > { %v305_v59 = vmul.f32 %v304_v58, %v286_v41 }
 0x2b4   : > { %306 = vst.msk [vmem:[%s226_s14] sm:$0x7] %vm288_vm4, %v305_v59 }
 0x2b5 PF: > { %p14_p7 = scmp.ge.s32.totalorder %s555_s20, 4   ;;  %s673_s15 = smov %s496_s16 }
 0x2b6   : > { %s674_s16 = smov %s500_s17  ;;  %s675_s17 = smov %s565_s23 }
 0x2b7   : > { %s676_s18 = smov %s555_s20  ;;  %16 = sbr.rel (!%p14_p7) target bundleno = 3 (0x3), region = 79 }
 0x2be   :  { %326 = vsyncpa [#allocation3], 1 }
 0x2bf   :  { %328 = vsyncpa [#allocation3 + $0x1], 1 }

</bundles_post_ra>
